<compile_context>
chip_gen: v7x
topology: tpu7x:2x2x1
jax: 0.10.0
libtpu: 0.0.40
codegen_flags: <defaults>
</compile_context>

<pallas_src>
import functools

import jax
import jax.numpy as jnp
from jax.experimental import pallas as pl
from jax.experimental.pallas import tpu as pltpu


_NEG_LARGE = -1.0e30  # effectively -inf for the masked softmax, without inf arithmetic
_LANE = 128


# --------------------------------------------------------------------------- #
# Helpers
# --------------------------------------------------------------------------- #
def _round_up(v: int, m: int) -> int:
    return ((v + m - 1) // m) * m


def _pad2(a, rows: int, cols: int):
    # Zero padding is load-bearing: padded adj rows/columns must stay 0 so the
    # padded node rows of h (which pick up relu(0 + b1) > 0) never feed layer 2.
    r, c = a.shape
    return jnp.pad(a, ((0, rows - r), (0, cols - c)))


def _pick_tile(n_p: int) -> int:
    """Largest row tile in {512, 256, 128} that divides the padded node count."""
    for t in (512, 256, 128):
        if n_p % t == 0:
            return t
    return n_p  # unreachable: n_p is always a multiple of 128


def _vmem_capacity_bytes() -> int:
    try:
        return int(pltpu.get_tpu_info().vmem_capacity_bytes)
    except Exception:
        return 64 * 1024 * 1024  # assume the smallest (v7x per-TensorCore VMEM)


def _compiler_params(dim_sem, vmem_limit):
    return pltpu.CompilerParams(dimension_semantics=dim_sem,
                                vmem_limit_bytes=vmem_limit)


# --------------------------------------------------------------------------- #
# Kernels
# --------------------------------------------------------------------------- #
def _epilogue(z, *, apply_relu: bool, num_valid_classes):
    """Fused bias-free epilogue in f32: optional ReLU, optional masked log_softmax."""
    if apply_relu:
        z = jnp.maximum(z, 0.0)
    if num_valid_classes is not None:
        # log_softmax over the class axis; padded class lanes are masked so they
        # cannot perturb the max / logsumexp.
        cols = jax.lax.broadcasted_iota(jnp.int32, z.shape, dimension=1)
        valid = cols < num_valid_classes
        zm = jnp.where(valid, z, _NEG_LARGE)
        m = jnp.max(zm, axis=-1, keepdims=True)
        e = jnp.where(valid, jnp.exp(zm - m), 0.0)
        lse = jnp.log(jnp.sum(e, axis=-1, keepdims=True))
        z = jnp.where(valid, zm - m - lse, 0.0)
    return z


def _feature_transform_kernel(x_ref, w_ref, out_ref):
    """XW row tile: out = x_tile @ W (bf16 MXU operands, f32 accumulation)."""
    out_ref[...] = jnp.dot(x_ref[...], w_ref[...],
                           preferred_element_type=jnp.float32).astype(out_ref.dtype)


def _agg_resident_kernel(adj_ref, xw_ref, b_ref, out_ref, *,
                         apply_relu: bool, num_valid_classes):
    """out[i] = epilogue(adj[i, :] @ XW + b) with XW fully VMEM-resident."""
    z = jnp.dot(adj_ref[...], xw_ref[...],
                preferred_element_type=jnp.float32) + b_ref[...]
    out_ref[...] = _epilogue(z, apply_relu=apply_relu,
                             num_valid_classes=num_valid_classes).astype(out_ref.dtype)


def _agg_streamed_kernel(adj_ref, xw_ref, b_ref, out_ref, acc_ref, *,
                         apply_relu: bool, num_valid_classes):
    """acc[i] += adj[i, k] @ XW[k]; bias / ReLU / log_softmax epilogue on last k."""
    k = pl.program_id(1)

    @pl.when(k == 0)
    def _init():
        acc_ref[...] = jnp.zeros_like(acc_ref)

    acc_ref[...] += jnp.dot(adj_ref[...], xw_ref[...],
                            preferred_element_type=jnp.float32)

    @pl.when(k == pl.num_programs(1) - 1)
    def _finalize():
        z = acc_ref[...] + b_ref[...]
        out_ref[...] = _epilogue(z, apply_relu=apply_relu,
                                 num_valid_classes=num_valid_classes).astype(out_ref.dtype)


def _fused_gcn_kernel(adj_ref, x_ref, w1_ref, b1_ref, w2_ref, b2_ref, out_ref, *,
                      num_valid_classes):
    """Small-graph fast path: both GraphConv layers in one kernel, everything
    VMEM-resident.  adj is read from HBM once; h never leaves VMEM."""
    xw1 = jnp.dot(x_ref[...], w1_ref[...], preferred_element_type=jnp.float32)
    h = jnp.dot(adj_ref[...], xw1.astype(jnp.bfloat16),
                preferred_element_type=jnp.float32) + b1_ref[...]
    # Padded node rows get relu(0 + b1) > 0 here; harmless because the matching
    # padded adj COLUMNS are zero, so they never contribute to layer 2.
    h = jnp.maximum(h, 0.0)
    hw2 = jnp.dot(h.astype(jnp.bfloat16), w2_ref[...],
                  preferred_element_type=jnp.float32)
    z = jnp.dot(adj_ref[...], hw2.astype(jnp.bfloat16),
                preferred_element_type=jnp.float32) + b2_ref[...]
    out_ref[...] = _epilogue(z, apply_relu=False,
                             num_valid_classes=num_valid_classes).astype(out_ref.dtype)


# --------------------------------------------------------------------------- #
# pallas_call wrappers
# --------------------------------------------------------------------------- #
def _feature_transform(x_p, w_p, *, tm, vmem_limit):
    """XW = x @ W, row-tiled, W held resident (constant block index)."""
    n_p, f_in_p = x_p.shape
    f_out_p = w_p.shape[1]
    cost = pl.CostEstimate(
        flops=2 * n_p * f_in_p * f_out_p,
        transcendentals=0,
        bytes_accessed=n_p * f_in_p * 2 + f_in_p * f_out_p * 2 + n_p * f_out_p * 2,
    )
    return pl.pallas_call(
        _feature_transform_kernel,
        out_shape=jax.ShapeDtypeStruct((n_p, f_out_p), jnp.bfloat16),
        grid_spec=pltpu.PrefetchScalarGridSpec(
            num_scalar_prefetch=0,
            grid=(n_p // tm,),
            in_specs=[
                pl.BlockSpec((tm, f_in_p), lambda i: (i, 0)),          # x row tile
                pl.BlockSpec((f_in_p, f_out_p), lambda i: (0, 0)),     # W resident
            ],
            out_specs=pl.BlockSpec((tm, f_out_p), lambda i: (i, 0)),
        ),
        compiler_params=_compiler_params(("parallel",), vmem_limit),
        cost_estimate=cost,
    )(x_p, w_p)


def _adj_aggregate(adj_p, xw_p, b_p, *, apply_relu, num_valid_classes, out_dtype,
                   vmem_limit, vmem_budget):
    """adj @ XW + b with fused epilogue; XW resident when it fits, streamed otherwise."""
    n_p = adj_p.shape[0]
    f_out_p = xw_p.shape[1]
    tm = _pick_tile(n_p)
    out_isz = jnp.dtype(out_dtype).itemsize
    n_exp = 0 if num_valid_classes is None else n_p * (f_out_p + 1)
    cost = pl.CostEstimate(
        flops=2 * n_p * n_p * f_out_p,
        transcendentals=n_exp,
        bytes_accessed=(n_p * n_p * 2 + n_p * f_out_p * 2 + f_out_p * 4
                        + n_p * f_out_p * out_isz),
    )

    # Resident path: the whole XW slab and a full adj row stripe live in VMEM, so
    # XW is fetched from HBM exactly once and there is no reduction axis at all.
    resident_bytes = (2 * tm * n_p * 2            # adj row stripes (double-buffered)
                      + 2 * n_p * f_out_p * 2     # XW (constant index; spare buffer)
                      + 2 * tm * f_out_p * out_isz
                      + 2 * f_out_p * 4)
    if resident_bytes <= vmem_budget:
        kernel = functools.partial(_agg_resident_kernel, apply_relu=apply_relu,
                                   num_valid_classes=num_valid_classes)
        return pl.pallas_call(
            kernel,
            out_shape=jax.ShapeDtypeStruct((n_p, f_out_p), out_dtype),
            grid_spec=pltpu.PrefetchScalarGridSpec(
                num_scalar_prefetch=0,
                grid=(n_p // tm,),
                in_specs=[
                    pl.BlockSpec((tm, n_p), lambda i: (i, 0)),         # adj row stripe
                    pl.BlockSpec((n_p, f_out_p), lambda i: (0, 0)),    # XW resident
                    pl.BlockSpec((1, f_out_p), lambda i: (0, 0)),      # bias resident
                ],
                out_specs=pl.BlockSpec((tm, f_out_p), lambda i: (i, 0)),
            ),
            compiler_params=_compiler_params(("parallel",), vmem_limit),
            cost_estimate=cost,
        )(adj_p, xw_p, b_p)

    # Streamed fallback for large graphs: (i, k) grid + f32 VMEM accumulator.
    # XW is re-fetched once per row stripe; tm is chosen large to amortize it.
    tk = min(tm, 256)
    kernel = functools.partial(_agg_streamed_kernel, apply_relu=apply_relu,
                               num_valid_classes=num_valid_classes)
    return pl.pallas_call(
        kernel,
        out_shape=jax.ShapeDtypeStruct((n_p, f_out_p), out_dtype),
        grid_spec=pltpu.PrefetchScalarGridSpec(
            num_scalar_prefetch=0,
            grid=(n_p // tm, n_p // tk),
            in_specs=[
                pl.BlockSpec((tm, tk), lambda i, k: (i, k)),           # adj tile
                pl.BlockSpec((tk, f_out_p), lambda i, k: (k, 0)),      # XW k tile
                pl.BlockSpec((1, f_out_p), lambda i, k: (0, 0)),       # bias resident
            ],
            out_specs=pl.BlockSpec((tm, f_out_p), lambda i, k: (i, 0)),
            scratch_shapes=[pltpu.VMEM((tm, f_out_p), jnp.float32)],
        ),
        compiler_params=_compiler_params(("parallel", "arbitrary"), vmem_limit),
        cost_estimate=cost,
    )(adj_p, xw_p, b_p)


# --------------------------------------------------------------------------- #
# Model wrapper
# --------------------------------------------------------------------------- #
def prepare_gcn(adj, w1, b1, w2, b2):
    """Pad + bf16-cast the graph-constant operands ONCE (re-padding/casting adj
    every forward is an extra O(N^2) HBM pass rivalling the kernels' adj traffic)."""
    n = adj.shape[0]
    n_p = _round_up(n, _LANE)
    f_in, hidden = w1.shape
    out_dim = w2.shape[1]
    f_in_p = _round_up(f_in, _LANE)
    hid_p = _round_up(hidden, _LANE)
    out_p = _round_up(out_dim, _LANE)
    return dict(
        adj_p=_pad2(adj, n_p, n_p).astype(jnp.bfloat16),
        w1_p=_pad2(w1, f_in_p, hid_p).astype(jnp.bfloat16),
        b1_p=_pad2(b1.reshape(1, -1), 1, hid_p).astype(jnp.float32),
        w2_p=_pad2(w2, hid_p, out_p).astype(jnp.bfloat16),
        b2_p=_pad2(b2.reshape(1, -1), 1, out_p).astype(jnp.float32),
        n=n, n_p=n_p, f_in=f_in, f_in_p=f_in_p, hid_p=hid_p,
        out_dim=out_dim, out_p=out_p,
    )


def gcn_forward_prepared(x, prep, use_fused=None):
    n, n_p = prep["n"], prep["n_p"]
    f_in_p, hid_p = prep["f_in_p"], prep["hid_p"]
    out_p, out_dim = prep["out_p"], prep["out_dim"]
    adj_p = prep["adj_p"]

    x_p = _pad2(x, n_p, f_in_p).astype(jnp.bfloat16)

    cap = _vmem_capacity_bytes()                 # 64 MiB on v7x, 128 MiB on v5e/v6e
    vmem_limit = min(cap * 3 // 4, 96 * 1024 * 1024)
    vmem_budget = cap // 2                       # leave headroom for double buffers

    fused_bytes = (n_p * n_p * 2 + n_p * f_in_p * 2 + f_in_p * hid_p * 2
                   + hid_p * out_p * 2 + (hid_p + out_p) * 4 + n_p * out_p * 4
                   + 6 * n_p * max(hid_p, out_p) * 4)   # f32 temporaries headroom
    if use_fused is None:
        use_fused = fused_bytes <= vmem_budget

    # ---- Small-graph fast path: one pallas_call for both layers ----
    if use_fused:
        cost = pl.CostEstimate(
            flops=2 * n_p * (f_in_p * hid_p + n_p * hid_p + hid_p * out_p + n_p * out_p),
            transcendentals=n_p * (out_p + 1),
            bytes_accessed=(n_p * n_p * 2 + n_p * f_in_p * 2 + f_in_p * hid_p * 2
                            + hid_p * out_p * 2 + (hid_p + out_p) * 4 + n_p * out_p * 4),
        )
        kernel = functools.partial(_fused_gcn_kernel, num_valid_classes=out_dim)
        z_p = pl.pallas_call(
            kernel,
            out_shape=jax.ShapeDtypeStruct((n_p, out_p), jnp.float32),
            grid_spec=pltpu.PrefetchScalarGridSpec(
                num_scalar_prefetch=0,
                grid=(1,),
                in_specs=[
                    pl.BlockSpec((n_p, n_p), lambda i: (0, 0)),
                    pl.BlockSpec((n_p, f_in_p), lambda i: (0, 0)),
                    pl.BlockSpec((f_in_p, hid_p), lambda i: (0, 0)),
                    pl.BlockSpec((1, hid_p), lambda i: (0, 0)),
                    pl.BlockSpec((hid_p, out_p), lambda i: (0, 0)),
                    pl.BlockSpec((1, out_p), lambda i: (0, 0)),
                ],
                out_specs=pl.BlockSpec((n_p, out_p), lambda i: (0, 0)),
            ),
            compiler_params=_compiler_params(("arbitrary",), vmem_limit),
            cost_estimate=cost,
        )(adj_p, x_p, prep["w1_p"], prep["b1_p"], prep["w2_p"], prep["b2_p"])
        return z_p[:n, :out_dim]

    # ---- Layered path: XW precomputed once per layer, then adj aggregation ----
    tm = _pick_tile(n_p)
    xw1 = _feature_transform(x_p, prep["w1_p"], tm=tm, vmem_limit=vmem_limit)
    h_p = _adj_aggregate(adj_p, xw1, prep["b1_p"], apply_relu=True,
                         num_valid_classes=None, out_dtype=jnp.bfloat16,
                         vmem_limit=vmem_limit, vmem_budget=vmem_budget)
    # Dropout: module evaluated in inference mode -> identity.
    # TODO(synk): training-mode dropout would use pltpu.prng_seed / prng_random_bits.
    hw2 = _feature_transform(h_p, prep["w2_p"], tm=tm, vmem_limit=vmem_limit)
    z_p = _adj_aggregate(adj_p, hw2, prep["b2_p"], apply_relu=False,
                         num_valid_classes=out_dim, out_dtype=jnp.float32,
                         vmem_limit=vmem_limit, vmem_budget=vmem_budget)
    return z_p[:n, :out_dim]


def gcn_forward(x, adj, w1, b1, w2, b2, use_fused=None):
    return gcn_forward_prepared(x, prepare_gcn(adj, w1, b1, w2, b2), use_fused=use_fused)


def reference_forward(x, adj, w1, b1, w2, b2):
    h = jnp.maximum(adj @ (x @ w1) + b1, 0.0)
    z = adj @ (h @ w2) + b2
    return jax.nn.log_softmax(z, axis=1)


# --------------------------------------------------------------------------- #
# Self-test
# --------------------------------------------------------------------------- #
if __name__ == "__main__":
    # Small deterministic problem: 16 nodes, input_dim=32, hidden_dim=32, output_dim=8.
    N, input_dim, hidden_dim, output_dim = 16, 32, 32, 8

    key = jax.random.PRNGKey(0)
    kx, kadj, kw1, kw2, kb1, kb2 = jax.random.split(key, 6)

    x = jax.random.normal(kx, (N, input_dim), dtype=jnp.float32)

    # Symmetric, row-normalized adjacency with self loops (typical GCN input).
    a = (jax.random.uniform(kadj, (N, N)) > 0.7).astype(jnp.float32)
    a = jnp.maximum(a, a.T) + jnp.eye(N, dtype=jnp.float32)
    adj = a / jnp.sum(a, axis=1, keepdims=True)

    lim1 = (6.0 / (input_dim + hidden_dim)) ** 0.5
    w1 = jax.random.uniform(kw1, (input_dim, hidden_dim), minval=-lim1, maxval=lim1)
    b1 = jax.random.uniform(kb1, (1, hidden_dim), minval=-0.1, maxval=0.1)
    lim2 = (6.0 / (hidden_dim + output_dim)) ** 0.5
    w2 = jax.random.uniform(kw2, (hidden_dim, output_dim), minval=-lim2, maxval=lim2)
    b2 = jax.random.uniform(kb2, (1, output_dim), minval=-0.1, maxval=0.1)

    # Pad/cast the graph-constant operands once; reuse across forward calls.
    prep = prepare_gcn(adj, w1, b1, w2, b2)
    ref = reference_forward(x, adj, w1, b1, w2, b2)

    # Fast fused path (auto-selected for this small graph).
    out_fused = jax.block_until_ready(gcn_forward_prepared(x, prep))
    # Layered path (XW-precompute + resident adj-aggregation), exercised explicitly.
    out_layered = jax.block_until_ready(gcn_forward_prepared(x, prep, use_fused=False))

    assert out_fused.shape == (N, output_dim)
    assert out_layered.shape == (N, output_dim)
    # bf16 MXU operands with f32 accumulation -> loosened tolerance.
    err_f = float(jnp.max(jnp.abs(out_fused - ref)))
    err_l = float(jnp.max(jnp.abs(out_layered - ref)))
    assert jnp.allclose(out_fused, ref, atol=5e-2, rtol=5e-2), f"fused max abs err = {err_f}"
    assert jnp.allclose(out_layered, ref, atol=5e-2, rtol=5e-2), f"layered max abs err = {err_l}"

    print("KERNEL_OK")
</pallas_src>

<mosaic_0001>
module attributes {stable_mosaic.version = 11 : i64} {
  func.func @_fused_gcn_kernel(%arg0: i32, %arg1: memref<128x128xbf16, #tpu.memory_space<vmem>>, %arg2: memref<128x128xbf16, #tpu.memory_space<vmem>>, %arg3: memref<128x128xbf16, #tpu.memory_space<vmem>>, %arg4: memref<1x128xf32, #tpu.memory_space<vmem>>, %arg5: memref<128x128xbf16, #tpu.memory_space<vmem>>, %arg6: memref<1x128xf32, #tpu.memory_space<vmem>>, %arg7: memref<128x128xf32, #tpu.memory_space<vmem>>) attributes {dimension_semantics = [#tpu.dimension_semantics<arbitrary>], iteration_bounds = array<i64: 1>, scalar_prefetch = 0 : i64, scratch_operands = 0 : i64, tpu.core_type = #tpu.core_type<tc>, window_params = [{pipeline_mode = #tpu.pipeline_mode<synchronous>, transform_indices = @transform_0, window_bounds = array<i64: 128, 128>}, {pipeline_mode = #tpu.pipeline_mode<synchronous>, transform_indices = @transform_1, window_bounds = array<i64: 128, 128>}, {pipeline_mode = #tpu.pipeline_mode<synchronous>, transform_indices = @transform_2, window_bounds = array<i64: 128, 128>}, {pipeline_mode = #tpu.pipeline_mode<synchronous>, transform_indices = @transform_3, window_bounds = array<i64: 1, 128>}, {pipeline_mode = #tpu.pipeline_mode<synchronous>, transform_indices = @transform_4, window_bounds = array<i64: 128, 128>}, {pipeline_mode = #tpu.pipeline_mode<synchronous>, transform_indices = @transform_5, window_bounds = array<i64: 1, 128>}, {pipeline_mode = #tpu.pipeline_mode<synchronous>, transform_indices = @transform_6, window_bounds = array<i64: 128, 128>}]} {
    %c0 = arith.constant 0 : index
    %c0_0 = arith.constant 0 : index
    %0 = vector.load %arg2[%c0, %c0_0] : memref<128x128xbf16, #tpu.memory_space<vmem>>, vector<128x128xbf16>
    %c0_1 = arith.constant 0 : index
    %c0_2 = arith.constant 0 : index
    %1 = vector.load %arg3[%c0_1, %c0_2] : memref<128x128xbf16, #tpu.memory_space<vmem>>, vector<128x128xbf16>
    %cst = arith.constant dense<0.000000e+00> : vector<128x128xf32>
    %2 = tpu.matmul %0, %1, %cst {dimension_numbers = #tpu.dot_dimension_numbers<[1], [0], [0], [1], [0, 0, 1, 1], [], []>} : vector<128x128xbf16>, vector<128x128xbf16>, vector<128x128xf32> -> vector<128x128xf32>
    %c0_3 = arith.constant 0 : index
    %c0_4 = arith.constant 0 : index
    %3 = vector.load %arg1[%c0_3, %c0_4] : memref<128x128xbf16, #tpu.memory_space<vmem>>, vector<128x128xbf16>
    %4 = arith.truncf %2 : vector<128x128xf32> to vector<128x128xbf16>
    %cst_5 = arith.constant dense<0.000000e+00> : vector<128x128xf32>
    %5 = tpu.matmul %3, %4, %cst_5 {dimension_numbers = #tpu.dot_dimension_numbers<[1], [0], [0], [1], [0, 0, 1, 1], [], []>} : vector<128x128xbf16>, vector<128x128xbf16>, vector<128x128xf32> -> vector<128x128xf32>
    %c0_6 = arith.constant 0 : index
    %c0_7 = arith.constant 0 : index
    %6 = vector.load %arg4[%c0_6, %c0_7] : memref<1x128xf32, #tpu.memory_space<vmem>>, vector<1x128xf32>
    %7 = vector.broadcast %6 : vector<1x128xf32> to vector<128x128xf32>
    %8 = arith.addf %5, %7 : vector<128x128xf32>
    %cst_8 = arith.constant 0.000000e+00 : f32
    %9 = vector.broadcast %cst_8 : f32 to vector<128x128xf32>
    %10 = arith.maximumf %8, %9 : vector<128x128xf32>
    %11 = arith.truncf %10 : vector<128x128xf32> to vector<128x128xbf16>
    %c0_9 = arith.constant 0 : index
    %c0_10 = arith.constant 0 : index
    %12 = vector.load %arg5[%c0_9, %c0_10] : memref<128x128xbf16, #tpu.memory_space<vmem>>, vector<128x128xbf16>
    %cst_11 = arith.constant dense<0.000000e+00> : vector<128x128xf32>
    %13 = tpu.matmul %11, %12, %cst_11 {dimension_numbers = #tpu.dot_dimension_numbers<[1], [0], [0], [1], [0, 0, 1, 1], [], []>} : vector<128x128xbf16>, vector<128x128xbf16>, vector<128x128xf32> -> vector<128x128xf32>
    %c0_12 = arith.constant 0 : index
    %c0_13 = arith.constant 0 : index
    %14 = vector.load %arg1[%c0_12, %c0_13] : memref<128x128xbf16, #tpu.memory_space<vmem>>, vector<128x128xbf16>
    %15 = arith.truncf %13 : vector<128x128xf32> to vector<128x128xbf16>
    %cst_14 = arith.constant dense<0.000000e+00> : vector<128x128xf32>
    %16 = tpu.matmul %14, %15, %cst_14 {dimension_numbers = #tpu.dot_dimension_numbers<[1], [0], [0], [1], [0, 0, 1, 1], [], []>} : vector<128x128xbf16>, vector<128x128xbf16>, vector<128x128xf32> -> vector<128x128xf32>
    %c0_15 = arith.constant 0 : index
    %c0_16 = arith.constant 0 : index
    %17 = vector.load %arg6[%c0_15, %c0_16] : memref<1x128xf32, #tpu.memory_space<vmem>>, vector<1x128xf32>
    %18 = vector.broadcast %17 : vector<1x128xf32> to vector<128x128xf32>
    %19 = arith.addf %16, %18 : vector<128x128xf32>
    %20 = tpu.iota {dimensions = array<i32: 1>} : vector<128x128xi32>
    %c8_i32 = arith.constant 8 : i32
    %21 = vector.broadcast %c8_i32 : i32 to vector<128x128xi32>
    %22 = arith.cmpi slt, %20, %21 : vector<128x128xi32>
    %cst_17 = arith.constant -1.000000e+30 : f32
    %23 = vector.broadcast %cst_17 : f32 to vector<128x128xf32>
    %24 = arith.select %22, %19, %23 : vector<128x128xi1>, vector<128x128xf32>
    %cst_18 = arith.constant dense<0xFF800000> : vector<128xf32>
    %25 = vector.multi_reduction <maximumf>, %24, %cst_18 [1] : vector<128x128xf32> to vector<128xf32>
    %26 = vector.shape_cast %25 : vector<128xf32> to vector<128x1xf32>
    %27 = vector.broadcast %26 : vector<128x1xf32> to vector<128x128xf32>
    %28 = arith.subf %24, %27 : vector<128x128xf32>
    %29 = math.exp %28 : vector<128x128xf32>
    %cst_19 = arith.constant 0.000000e+00 : f32
    %30 = vector.broadcast %cst_19 : f32 to vector<128x128xf32>
    %31 = arith.select %22, %29, %30 : vector<128x128xi1>, vector<128x128xf32>
    %cst_20 = arith.constant dense<0.000000e+00> : vector<128xf32>
    %32 = vector.multi_reduction <add>, %31, %cst_20 [1] : vector<128x128xf32> to vector<128xf32>
    %33 = vector.shape_cast %32 : vector<128xf32> to vector<128x1xf32>
    %34 = math.log %33 : vector<128x1xf32>
    %35 = vector.broadcast %26 : vector<128x1xf32> to vector<128x128xf32>
    %36 = arith.subf %24, %35 : vector<128x128xf32>
    %37 = vector.broadcast %34 : vector<128x1xf32> to vector<128x128xf32>
    %38 = arith.subf %36, %37 : vector<128x128xf32>
    %cst_21 = arith.constant 0.000000e+00 : f32
    %39 = vector.broadcast %cst_21 : f32 to vector<128x128xf32>
    %40 = arith.select %22, %38, %39 : vector<128x128xi1>, vector<128x128xf32>
    %c0_22 = arith.constant 0 : index
    %c0_23 = arith.constant 0 : index
    %41 = vector.load %arg7[%c0_22, %c0_23] : memref<128x128xf32, #tpu.memory_space<vmem>>, vector<128x128xf32>
    tpu.vector_store %arg7[%c0_22, %c0_23], %40 {strides = array<i32>} : memref<128x128xf32, #tpu.memory_space<vmem>>, vector<128x128xf32>,
    return
  }
  func.func @transform_0(%arg0: i32) -> (i32, i32) {
    %c0_i32 = arith.constant 0 : i32
    %c0_i32_0 = arith.constant 0 : i32
    %c0_i32_1 = arith.constant 0 : i32
    return %c0_i32, %c0_i32_0 : i32, i32
  }
  func.func @transform_1(%arg0: i32) -> (i32, i32) {
    %c0_i32 = arith.constant 0 : i32
    %c0_i32_0 = arith.constant 0 : i32
    %c0_i32_1 = arith.constant 0 : i32
    return %c0_i32, %c0_i32_0 : i32, i32
  }
  func.func @transform_2(%arg0: i32) -> (i32, i32) {
    %c0_i32 = arith.constant 0 : i32
    %c0_i32_0 = arith.constant 0 : i32
    %c0_i32_1 = arith.constant 0 : i32
    return %c0_i32, %c0_i32_0 : i32, i32
  }
  func.func @transform_3(%arg0: i32) -> (i32, i32) {
    %c0_i32 = arith.constant 0 : i32
    %c0_i32_0 = arith.constant 0 : i32
    %c0_i32_1 = arith.constant 0 : i32
    return %c0_i32, %c0_i32_0 : i32, i32
  }
  func.func @transform_4(%arg0: i32) -> (i32, i32) {
    %c0_i32 = arith.constant 0 : i32
    %c0_i32_0 = arith.constant 0 : i32
    %c0_i32_1 = arith.constant 0 : i32
    return %c0_i32, %c0_i32_0 : i32, i32
  }
  func.func @transform_5(%arg0: i32) -> (i32, i32) {
    %c0_i32 = arith.constant 0 : i32
    %c0_i32_0 = arith.constant 0 : i32
    %c0_i32_1 = arith.constant 0 : i32
    return %c0_i32, %c0_i32_0 : i32, i32
  }
  func.func @transform_6(%arg0: i32) -> (i32, i32) {
    %c0_i32 = arith.constant 0 : i32
    %c0_i32_0 = arith.constant 0 : i32
    %c0_i32_1 = arith.constant 0 : i32
    return %c0_i32, %c0_i32_0 : i32, i32
  }
}

</mosaic_0001>

<bundles_post_ra>
// kernel: tpu_custom_call.1
= control target key start
LH: loop header
LB: loop body
LE: loop exit
PB: predicated region body
PF: predicated region fallthrough
CT: control target
= control target key end

     0   :  { %11 = vsyncpa [#allocation3], 0  ;;  %s1828_s0 = inlined_call_operand.hbm [shape: bf16[128,128], index: 0, kind: input, shape index: {}]   ;;  %s1829_s1 = inlined_call_operand.hbm [shape: bf16[128,128], index: 1, kind: input, shape index: {}]   ;;  %s1830_s2 = inlined_call_operand.hbm [shape: bf16[128,128], index: 2, kind: input, shape index: {}]   ;;  %s1831_s3 = inlined_call_operand.vmem [shape: f32[1,128], index: 3, kind: input, shape index: {}]   ;;  %s1832_s4 = inlined_call_operand.hbm [shape: bf16[128,128], index: 4, kind: input, shape index: {}]   ;;  %s1833_s5 = inlined_call_operand.vmem [shape: f32[1,128], index: 5, kind: input, shape index: {}]   ;;  %s1834_s6 = inlined_call_operand.hbm [shape: f32[128,128], index: 6, kind: output, shape index: {}]  }
   0x1   :  { %12 = vsyncpa [#allocation6], 0 }
   0x2   :  { %13 = vsyncpa [#allocation9], 0 }
   0x3   :  { %14 = vsyncpa [#allocation4], 0  ;;  %s1473_s21 = smov [#allocation5]   ;;  %s1474_s23 = smov [#allocation2]  }
   0x4   :  { %s32_s22 = sshll.u32 %s1473_s21, 4  ;;  %s20_s24 = sshll.u32 %s1474_s23, 4  ;;  %s33_s22 = int_to_ptr.vmem [resolvable:$true] %s32_s22  ;;  %s1517_s24 = int_to_ptr.vmem [resolvable:$true] %s20_s24 }
   0x5   :  { %s1355_s27 = scalar_lea.hbm %s1829_s1, 1024 }
   0x6   :  { %p1356_p0 = scmp.ne.s32.totalorder %s1829_s1, %s1355_s27  ;;  %p1359_p1 = scmp.lt.u32.totalorder %s1355_s27, %s1829_s1 }
   0x8   :  { %p1361_p2 = pnand %p1359_p1, %p1356_p0 }
   0xa   :  { %1364 = shalt.err (!%p1361_p2)
}
   0xb   :  { %s1365_s8 = scalar_lea.vmem %s33_s22, 1024  ;;  %p1370_p4 = scmp.lt.s32.totalorder %s33_s22, %s33_s22 }
   0xc   :  { %p1366_p3 = scmp.ne.s32.totalorder %s33_s22, %s1365_s8  ;;  %p1371_p5 = scmp.lt.s32.totalorder %s1365_s8, %s1365_s8 }
   0xe   :  { %p1372_p6 = por %p1371_p5, %p1370_p4 }
  0x10   :  { %p1373_p7 = pnand %p1372_p6, %p1366_p3 }
  0x12   :  { %1376 = shalt.err (!%p1373_p7)
}
  0x13   :  { %s1475_s9 = smov 64   ;;  %s1476_s10 = smov 4  }
  0x14   :  { %38 = dma.hbm_to_vmem [thread:$0]  %s1829_s1, 1024, %s33_s22, [#allocation6], %s1475_s9, %s1475_s9, %s1476_s10  }
  0x15   :  { %s1377_s15 = scalar_lea.hbm %s1828_s0, 1024 }
  0x16   :  { %p1378_p8 = scmp.ne.s32.totalorder %s1828_s0, %s1377_s15  ;;  %p1381_p9 = scmp.lt.u32.totalorder %s1377_s15, %s1828_s0 }
  0x18   :  { %p1383_p10 = pnand %p1381_p9, %p1378_p8 }
  0x1a   :  { %1386 = shalt.err (!%p1383_p10)
}
  0x1b   :  { %s1387_s20 = scalar_lea.vmem %s1517_s24, 1024  ;;  %p1392_p12 = scmp.lt.s32.totalorder %s1517_s24, %s1517_s24 }
  0x1c   :  { %p1388_p11 = scmp.ne.s32.totalorder %s1517_s24, %s1387_s20  ;;  %p1393_p13 = scmp.lt.s32.totalorder %s1387_s20, %s1387_s20 }
  0x1e   :  { %p1394_p0 = por %p1393_p13, %p1392_p12 }
  0x20   :  { %p1395_p1 = pnand %p1394_p0, %p1388_p11 }
  0x22   :  { %1398 = shalt.err (!%p1395_p1)
}
  0x23   :  { %26 = dma.hbm_to_vmem [thread:$0]  %s1828_s0, 1024, %s1517_s24, [#allocation3], %s1475_s9, %s1475_s9, %s1476_s10  }
  0x24   :  { %s1477_s22 = smov [#allocation7]   ;;  %s1478_s25 = smov [#allocation8]  }
  0x25   :  { %s44_s23 = sshll.u32 %s1477_s22, 4  ;;  %s58_s26 = sshll.u32 %s1478_s25, 4  ;;  %s45_s23 = int_to_ptr.vmem [resolvable:$true] %s44_s23  ;;  %s1554_s26 = int_to_ptr.vmem [resolvable:$true] %s58_s26 }
  0x26   :  { %s1399_s29 = scalar_lea.hbm %s1830_s2, 1024 }
  0x27   :  { %p1400_p2 = scmp.ne.s32.totalorder %s1830_s2, %s1399_s29  ;;  %p1403_p3 = scmp.lt.u32.totalorder %s1399_s29, %s1830_s2 }
  0x29   :  { %p1405_p4 = pnand %p1403_p3, %p1400_p2 }
  0x2b   :  { %1408 = shalt.err (!%p1405_p4)
}
  0x2c   :  { %s1409_s0 = scalar_lea.vmem %s45_s23, 1024  ;;  %p1414_p6 = scmp.lt.s32.totalorder %s45_s23, %s45_s23 }
  0x2d   :  { %p1410_p5 = scmp.ne.s32.totalorder %s45_s23, %s1409_s0  ;;  %p1415_p7 = scmp.lt.s32.totalorder %s1409_s0, %s1409_s0 }
  0x2f   :  { %p1416_p8 = por %p1415_p7, %p1414_p6 }
  0x31   :  { %p1417_p9 = pnand %p1416_p8, %p1410_p5 }
  0x33   :  { %1420 = shalt.err (!%p1417_p9)
}
  0x34   :  { %50 = dma.hbm_to_vmem [thread:$0]  %s1830_s2, 1024, %s45_s23, [#allocation6], %s1475_s9, %s1475_s9, %s1476_s10  }
  0x35   :  { %s1421_s15 = scalar_lea.hbm %s1832_s4, 1024 }
  0x36   :  { %p1422_p10 = scmp.ne.s32.totalorder %s1832_s4, %s1421_s15  ;;  %p1425_p11 = scmp.lt.u32.totalorder %s1421_s15, %s1832_s4 }
  0x38   :  { %p1427_p12 = pnand %p1425_p11, %p1422_p10 }
  0x3a   :  { %1430 = shalt.err (!%p1427_p12)
}
  0x3b   :  { %s1431_s20 = scalar_lea.vmem %s1554_s26, 1024  ;;  %p1436_p0 = scmp.lt.s32.totalorder %s1554_s26, %s1554_s26 }
  0x3c   :  { %p1432_p13 = scmp.ne.s32.totalorder %s1554_s26, %s1431_s20  ;;  %p1437_p1 = scmp.lt.s32.totalorder %s1431_s20, %s1431_s20 }
  0x3e   :  { %p1438_p2 = por %p1437_p1, %p1436_p0 }
  0x40   :  { %p1439_p3 = pnand %p1438_p2, %p1432_p13 }
  0x42   :  { %1442 = shalt.err (!%p1439_p3)
}
  0x43   :  { %64 = dma.hbm_to_vmem [thread:$0]  %s1832_s4, 1024, %s1554_s26, [#allocation9], %s1475_s9, %s1475_s9, %s1476_s10  }
  0x44   :  { %1465 = dma.done.wait [#allocation3], 1024  }
  0x45   :  { %1466 = vsyncadd [#allocation3], 4294966272 }
  0x46   :  { %1467 = dma.done.wait [#allocation6], 2048  }
  0x47   :  { %1468 = vsyncadd [#allocation6], 4294965248 }
  0x48   :  { %1469 = dma.done.wait [#allocation9], 1024  }
  0x49   :  { %1470 = vsyncadd [#allocation9], 4294966272  ;;  %v1259_v0 = vld [vmem:[#allocation7] sm:$0xff]   ;;  %v1260_v1 = vld [vmem:[#allocation7 + $0x8] sm:$0xff]  }
  0x4a   :  { %1122 = vmatprep.subr.bf16.mxu0 %v1259_v0  ;;  %v1261_v2 = vld [vmem:[#allocation7 + $0x10] sm:$0xff]   ;;  %v1262_v3 = vld [vmem:[#allocation7 + $0x18] sm:$0xff]   ;;  %v1267_v4 = vld [vmem:[#allocation5] sm:$0xff]  }
  0x4b   :  { %1123 = vmatpush3.bf16.msra.mxu0 %v1259_v0  ;;  %1138 = vmatprep.mubr.bf16.mxu0 %v1267_v4  ;;  %v1263_v5 = vld [vmem:[#allocation7 + $0x20] sm:$0xff]   ;;  %v1264_v6 = vld [vmem:[#allocation7 + $0x28] sm:$0xff]   ;;  %v1265_v7 = vld [vmem:[#allocation7 + $0x30] sm:$0xff]  }
  0x4c   :  { %1124 = vmatprep.subr.bf16.mxu0 %v1260_v1  ;;  %v1266_v8 = vld [vmem:[#allocation7 + $0x38] sm:$0xff]   ;;  %v1268_v9 = vld [vmem:[#allocation5 + $0x8] sm:$0xff]   ;;  %v1269_v10 = vld [vmem:[#allocation5 + $0x10] sm:$0xff]  }
  0x4d   :  { %v1270_v11 = vld [vmem:[#allocation5 + $0x18] sm:$0xff]   ;;  %v1271_v12 = vld [vmem:[#allocation5 + $0x20] sm:$0xff]   ;;  %v1272_v13 = vld [vmem:[#allocation5 + $0x28] sm:$0xff]  }
  0x4e   :  { %v1273_v14 = vld [vmem:[#allocation5 + $0x30] sm:$0xff]   ;;  %v1274_v15 = vld [vmem:[#allocation5 + $0x38] sm:$0xff]   ;;  %v1591_v16 = vld [vmem:[#allocation2] sm:$0xff]  }
  0x4f   :  { %1125 = vmatpush3.bf16.msra.mxu0 %v1260_v1  ;;  %1170 = vmatprep.mubr.bf16.mxu1 %v1591_v16  ;;  %v1283_v17 = vld [vmem:[#allocation8] sm:$0xff]   ;;  %v1284_v18 = vld [vmem:[#allocation8 + $0x8] sm:$0xff]   ;;  %v1285_v19 = vld [vmem:[#allocation8 + $0x10] sm:$0xff]  }
  0x50   :  { %1126 = vmatprep.subr.bf16.mxu0 %v1261_v2  ;;  %v1286_v20 = vld [vmem:[#allocation8 + $0x18] sm:$0xff]   ;;  %v1287_v21 = vld [vmem:[#allocation8 + $0x20] sm:$0xff]   ;;  %v1288_v22 = vld [vmem:[#allocation8 + $0x28] sm:$0xff]  }
  0x51   :  { %v1594_v47 = vld [vmem:[#allocation2 + $0x8] sm:$0xff]   ;;  %v1596_v48 = vld [vmem:[#allocation2 + $0x10] sm:$0xff]   ;;  %v1600_v49 = vld [vmem:[#allocation2 + $0x18] sm:$0xff]  }
  0x52   :  { %v1602_v50 = vld [vmem:[#allocation2 + $0x20] sm:$0xff]   ;;  %v1606_v51 = vld [vmem:[#allocation2 + $0x28] sm:$0xff]   ;;  %v1608_v52 = vld [vmem:[#allocation2 + $0x30] sm:$0xff]  }
  0x53   :  { %1127 = vmatpush3.bf16.msra.mxu0 %v1261_v2  ;;  %v1612_v53 = vld [vmem:[#allocation2 + $0x38] sm:$0xff]   ;;  %v1289_v54 = vld [vmem:[#allocation8 + $0x30] sm:$0xff]   ;;  %v1040_v56 = vld [vmem:[%s1831_s3] ss:$0 sm:$0xff] }
  0x54   :  { %1128 = vmatprep.subr.bf16.mxu0 %v1262_v3  ;;  %v1290_v55 = vld [vmem:[#allocation8 + $0x38] sm:$0xff]  }
  0x57   :  { %1129 = vmatpush3.bf16.msra.mxu0 %v1262_v3 }
  0x58   :  { %1130 = vmatprep.subr.bf16.mxu0 %v1263_v5 }
  0x5b   :  { %1131 = vmatpush3.bf16.msra.mxu0 %v1263_v5 }
  0x5c   :  { %1132 = vmatprep.subr.bf16.mxu0 %v1264_v6 }
  0x5f   :  { %1133 = vmatpush3.bf16.msra.mxu0 %v1264_v6 }
  0x60   :  { %1134 = vmatprep.subr.bf16.mxu0 %v1265_v7 }
  0x63   :  { %1135 = vmatpush3.bf16.msra.mxu0 %v1265_v7 }
  0x64   :  { %1136 = vmatprep.subr.bf16.mxu0 %v1266_v8 }
  0x67   :  { %1137 = vmatpush3.bf16.msra.mxu0 %v1266_v8 }
  0x68   :  { %1186 = vmatprep.subr.bf16.mxu0 %v1283_v17 }
  0x6a   :  { %1139 = vmatmul.mubr.bf16.vlgmr.msra.gmra.mrb[0].mxu0 %v1268_v9 }
  0x6b   :  { %1142 = vmatprep.mubr.bf16.mxu0 %v1269_v10  ;;  %1187 = vmatpush3.bf16.msra.mxu0 %v1283_v17 }
  0x6c   :  { %1188 = vmatprep.subr.bf16.mxu0 %v1284_v18 }
  0x6f   :  { %1189 = vmatpush3.bf16.msra.mxu0 %v1284_v18 }
  0x70   :  { %1190 = vmatprep.subr.bf16.mxu0 %v1285_v19 }
  0x72   :  { %1143 = vmatmul.mubr.bf16.gmra.mrb[4].mxu0 %v1270_v11 }
  0x73   :  { %1146 = vmatprep.mubr.bf16.mxu0 %v1271_v12  ;;  %1191 = vmatpush3.bf16.msra.mxu0 %v1285_v19 }
  0x74   :  { %1192 = vmatprep.subr.bf16.mxu0 %v1286_v20 }
  0x77   :  { %1193 = vmatpush3.bf16.msra.mxu0 %v1286_v20 }
  0x78   :  { %1194 = vmatprep.subr.bf16.mxu0 %v1287_v21 }
  0x7a   :  { %1147 = vmatmul.mubr.bf16.gmra.mrb[8].mxu0 %v1272_v13 }
  0x7b   :  { %1150 = vmatprep.mubr.bf16.mxu0 %v1273_v14  ;;  %1195 = vmatpush3.bf16.msra.mxu0 %v1287_v21 }
  0x7c   :  { %1196 = vmatprep.subr.bf16.mxu0 %v1288_v22 }
  0x7f   :  { %1197 = vmatpush3.bf16.msra.mxu0 %v1288_v22 }
  0x80   :  { %1198 = vmatprep.subr.bf16.mxu0 %v1289_v54 }
  0x82   :  { %1151 = vmatmul.mubr.bf16.gmra.mrb[12].mxu0 %v1274_v15 }
  0x83   :  { %1199 = vmatpush3.bf16.msra.mxu0 %v1289_v54 }
  0x84   :  { %1200 = vmatprep.subr.bf16.mxu0 %v1290_v55 }
  0x87   :  { %1201 = vmatpush3.bf16.msra.mxu0 %v1290_v55 }
 0x13d   :  { %v1140_v23 = vpop.f32.mrb[0].mxu0 }
 0x13e   :  { %v242_v24 = vpop.f32.mrb[1].mxu0 }
 0x13f   :  { %v1141_v25 = vpop.f32.mrb[2].mxu0 }
 0x140   :  { %v322_v26 = vpack.c.bf16 %v1141_v25, %v1140_v23  ;;  %v245_v27 = vpop.f32.mrb[3].mxu0 }
 0x141   :  { %v321_v28 = vpack.c.bf16 %v245_v27, %v242_v24 }
 0x143   :  { %1154 = vmatprep.subr.bf16.mxu1 %v321_v28 }
 0x144   :  { %1155 = vmatpush3.bf16.msra.mxu1 %v321_v28 }
 0x145   :  { %v1144_v29 = vpop.f32.mrb[4].mxu0  ;;  %1156 = vmatprep.subr.bf16.mxu1 %v322_v26 }
 0x146   :  { %v258_v30 = vpop.f32.mrb[5].mxu0 }
 0x147   :  { %v1145_v31 = vpop.f32.mrb[6].mxu0 }
 0x148   :  { %v324_v32 = vpack.c.bf16 %v1145_v31, %v1144_v29  ;;  %v261_v33 = vpop.f32.mrb[7].mxu0  ;;  %1157 = vmatpush3.bf16.msra.mxu1 %v322_v26 }
 0x149   :  { %v323_v34 = vpack.c.bf16 %v261_v33, %v258_v30 }
 0x14b   :  { %1158 = vmatprep.subr.bf16.mxu1 %v323_v34 }
 0x14c   :  { %1159 = vmatpush3.bf16.msra.mxu1 %v323_v34 }
 0x14d   :  { %v1148_v35 = vpop.f32.mrb[8].mxu0  ;;  %1160 = vmatprep.subr.bf16.mxu1 %v324_v32 }
 0x14e   :  { %v274_v36 = vpop.f32.mrb[9].mxu0 }
 0x14f   :  { %v1149_v37 = vpop.f32.mrb[10].mxu0 }
 0x150   :  { %v326_v38 = vpack.c.bf16 %v1149_v37, %v1148_v35  ;;  %v277_v39 = vpop.f32.mrb[11].mxu0  ;;  %1161 = vmatpush3.bf16.msra.mxu1 %v324_v32 }
 0x151   :  { %v325_v40 = vpack.c.bf16 %v277_v39, %v274_v36 }
 0x153   :  { %1162 = vmatprep.subr.bf16.mxu1 %v325_v40 }
 0x154   :  { %1163 = vmatpush3.bf16.msra.mxu1 %v325_v40 }
 0x155   :  { %v1152_v41 = vpop.f32.mrb[12].mxu0  ;;  %1164 = vmatprep.subr.bf16.mxu1 %v326_v38 }
 0x156   :  { %v290_v42 = vpop.f32.mrb[13].mxu0 }
 0x157   :  { %v1153_v43 = vpop.f32.mrb[14].mxu0 }
 0x158   :  { %v328_v44 = vpack.c.bf16 %v1153_v43, %v1152_v41  ;;  %v293_v45 = vpop.f32.mrb[15].mxu0  ;;  %1165 = vmatpush3.bf16.msra.mxu1 %v326_v38 }
 0x159   :  { %v327_v46 = vpack.c.bf16 %v293_v45, %v290_v42 }
 0x15b   :  { %1166 = vmatprep.subr.bf16.mxu1 %v327_v46 }
 0x15c   :  { %1167 = vmatpush3.bf16.msra.mxu1 %v327_v46 }
 0x15d   :  { %1168 = vmatprep.subr.bf16.mxu1 %v328_v44 }
 0x160   :  { %1169 = vmatpush3.bf16.msra.mxu1 %v328_v44 }
 0x163   :  { %1171 = vmatmul.mubr.bf16.vlgmr.msra.gmra.mrb[0].mxu1 %v1594_v47 }
 0x164   :  { %1174 = vmatprep.mubr.bf16.mxu1 %v1596_v48 }
 0x16b   :  { %1175 = vmatmul.mubr.bf16.gmra.mrb[4].mxu1 %v1600_v49 }
 0x16c   :  { %1178 = vmatprep.mubr.bf16.mxu1 %v1602_v50 }
 0x173   :  { %1179 = vmatmul.mubr.bf16.gmra.mrb[8].mxu1 %v1606_v51 }
 0x174   :  { %1182 = vmatprep.mubr.bf16.mxu1 %v1608_v52 }
 0x17b   :  { %1183 = vmatmul.mubr.bf16.gmra.mrb[12].mxu1 %v1612_v53 }
 0x17c   :  { %1234 = vmatprep.mubr.bf16.mxu1 %v1591_v16 }
 0x236   :  { %v1172_v57 = vpop.f32.mrb[0].mxu1 }
 0x237   :  { %v427_v58 = vadd.f32 %v1172_v57, %v1040_v56  ;;  %v418_v59 = vpop.f32.mrb[1].mxu1 }
 0x238   :  { %v419_v60 = vadd.f32 %v1040_v56, %v418_v59  ;;  %v1173_v61 = vpop.f32.mrb[2].mxu1 }
 0x239   :  { %v430_v62 = vadd.f32 %v1173_v61, %v1040_v56  ;;  %v421_v63 = vpop.f32.mrb[3].mxu1  ;;  %v483_v1 = vmax.f32 %v427_v58, 0.0 }
 0x23a   :  { %v422_v0 = vadd.f32 %v1040_v56, %v421_v63  ;;  %v481_v3 = vmax.f32 %v419_v60, 0.0 }
 0x23b   :  { %v484_v2 = vmax.f32 %v430_v62, 0.0 }
 0x23c   :  { %v482_v4 = vmax.f32 %v422_v0, 0.0 }
 0x23d   :  { %v498_v5 = vpack.c.bf16 %v484_v2, %v483_v1 }
 0x23e   :  { %v497_v6 = vpack.c.bf16 %v482_v4, %v481_v3  ;;  %v1176_v7 = vpop.f32.mrb[4].mxu1 }
 0x23f   :  { %v443_v8 = vadd.f32 %v1176_v7, %v1040_v56  ;;  %v434_v9 = vpop.f32.mrb[5].mxu1 }
 0x240   :  { %v435_v10 = vadd.f32 %v1040_v56, %v434_v9  ;;  %v1177_v11 = vpop.f32.mrb[6].mxu1  ;;  %1202 = vmatprep.mubr.bf16.mxu0 %v497_v6 }
 0x241   :  { %v446_v12 = vadd.f32 %v1177_v11, %v1040_v56  ;;  %v437_v13 = vpop.f32.mrb[7].mxu1  ;;  %1203 = vmatmul.mubr.bf16.vlgmr.msra.gmra.mrb[16].mxu0 %v498_v5  ;;  %v487_v15 = vmax.f32 %v443_v8, 0.0 }
 0x242   :  { %v438_v14 = vadd.f32 %v1040_v56, %v437_v13  ;;  %v485_v17 = vmax.f32 %v435_v10, 0.0 }
 0x243   :  { %v488_v16 = vmax.f32 %v446_v12, 0.0 }
 0x244   :  { %v486_v18 = vmax.f32 %v438_v14, 0.0 }
 0x245   :  { %v500_v19 = vpack.c.bf16 %v488_v16, %v487_v15  ;;  %v778_v16 = vlaneseq }
 0x246   :  { %v499_v20 = vpack.c.bf16 %v486_v18, %v485_v17  ;;  %v1180_v21 = vpop.f32.mrb[8].mxu1  ;;  %v1057_v18 = vld [vmem:[%s1833_s5] ss:$0 sm:$0xff]  ;;  %s1479_s5 = smov [#allocation10]  }
 0x247   :  { %v459_v22 = vadd.f32 %v1180_v21, %v1040_v56  ;;  %v450_v23 = vpop.f32.mrb[9].mxu1  ;;  %v1626_v17 = vand.u32 127, %v778_v16  ;;  %s1010_s21 = sshll.u32 %s1479_s5, 4  ;;  %s1011_s21 = int_to_ptr.vmem [resolvable:$true] %s1010_s21 }
 0x248   :  { %v451_v24 = vadd.f32 %v1040_v56, %v450_v23  ;;  %v1181_v25 = vpop.f32.mrb[10].mxu1  ;;  %1206 = vmatprep.mubr.bf16.mxu0 %v499_v20  ;;  %s1443_s22 = scalar_lea.vmem %s1011_s21, 2048  ;;  %p1448_p5 = scmp.lt.s32.totalorder %s1011_s21, %s1011_s21 }
 0x249   :  { %v462_v26 = vadd.f32 %v1181_v25, %v1040_v56  ;;  %v453_v27 = vpop.f32.mrb[11].mxu1  ;;  %1207 = vmatmul.mubr.bf16.gmra.mrb[20].mxu0 %v500_v19  ;;  %v491_v29 = vmax.f32 %v459_v22, 0.0  ;;  %vm780_vm0 = vcmp.lt.s32.totalorder %v1626_v17, 8  ;;  %p1444_p4 = scmp.ne.s32.totalorder %s1011_s21, %s1443_s22  ;;  %p1449_p6 = scmp.lt.s32.totalorder %s1443_s22, %s1443_s22 }
 0x24a   :  { %v454_v28 = vadd.f32 %v1040_v56, %v453_v27  ;;  %v489_v31 = vmax.f32 %v451_v24, 0.0 }
 0x24b   :  { %v492_v30 = vmax.f32 %v462_v26, 0.0  ;;  %p1450_p7 = por %p1449_p6, %p1448_p5 }
 0x24c   :  { %v490_v32 = vmax.f32 %v454_v28, 0.0 }
 0x24d   :  { %v502_v33 = vpack.c.bf16 %v492_v30, %v491_v29  ;;  %p1451_p8 = pnand %p1450_p7, %p1444_p4 }
 0x24e   :  { %v501_v34 = vpack.c.bf16 %v490_v32, %v489_v31  ;;  %v1184_v35 = vpop.f32.mrb[12].mxu1 }
 0x24f   :  { %v475_v36 = vadd.f32 %v1184_v35, %v1040_v56  ;;  %v466_v37 = vpop.f32.mrb[13].mxu1 }
 0x250   :  { %v467_v38 = vadd.f32 %v1040_v56, %v466_v37  ;;  %v1185_v39 = vpop.f32.mrb[14].mxu1  ;;  %1210 = vmatprep.mubr.bf16.mxu0 %v501_v34 }
 0x251   :  { %v478_v40 = vadd.f32 %v1185_v39, %v1040_v56  ;;  %v469_v41 = vpop.f32.mrb[15].mxu1  ;;  %1211 = vmatmul.mubr.bf16.gmra.mrb[24].mxu0 %v502_v33  ;;  %v495_v43 = vmax.f32 %v475_v36, 0.0 }
 0x252   :  { %v470_v42 = vadd.f32 %v1040_v56, %v469_v41  ;;  %v493_v45 = vmax.f32 %v467_v38, 0.0 }
 0x253   :  { %v496_v44 = vmax.f32 %v478_v40, 0.0 }
 0x254   :  { %v494_v46 = vmax.f32 %v470_v42, 0.0 }
 0x255   :  { %v504_v54 = vpack.c.bf16 %v496_v44, %v495_v43 }
 0x256   :  { %v503_v55 = vpack.c.bf16 %v494_v46, %v493_v45 }
 0x258   :  { %1214 = vmatprep.mubr.bf16.mxu0 %v503_v55 }
 0x259   :  { %1215 = vmatmul.mubr.bf16.gmra.mrb[28].mxu0 %v504_v54 }
 0x314   :  { %v1204_v57 = vpop.f32.mrb[16].mxu0 }
 0x315   :  { %v603_v58 = vpop.f32.mrb[17].mxu0 }
 0x316   :  { %v1205_v59 = vpop.f32.mrb[18].mxu0 }
 0x317   :  { %v667_v60 = vpack.c.bf16 %v1205_v59, %v1204_v57  ;;  %v606_v61 = vpop.f32.mrb[19].mxu0 }
 0x318   :  { %v666_v62 = vpack.c.bf16 %v606_v61, %v603_v58 }
 0x31a   :  { %1218 = vmatprep.subr.bf16.mxu1 %v666_v62 }
 0x31b   :  { %1219 = vmatpush3.bf16.msra.mxu1 %v666_v62 }
 0x31c   :  { %v1208_v63 = vpop.f32.mrb[20].mxu0  ;;  %1220 = vmatprep.subr.bf16.mxu1 %v667_v60 }
 0x31d   :  { %v619_v0 = vpop.f32.mrb[21].mxu0 }
 0x31e   :  { %v1209_v56 = vpop.f32.mrb[22].mxu0 }
 0x31f   :  { %v669_v1 = vpack.c.bf16 %v1209_v56, %v1208_v63  ;;  %v622_v2 = vpop.f32.mrb[23].mxu0  ;;  %1221 = vmatpush3.bf16.msra.mxu1 %v667_v60 }
 0x320   :  { %v668_v3 = vpack.c.bf16 %v622_v2, %v619_v0 }
 0x322   :  { %1222 = vmatprep.subr.bf16.mxu1 %v668_v3 }
 0x323   :  { %1223 = vmatpush3.bf16.msra.mxu1 %v668_v3 }
 0x324   :  { %v1212_v4 = vpop.f32.mrb[24].mxu0  ;;  %1224 = vmatprep.subr.bf16.mxu1 %v669_v1 }
 0x325   :  { %v635_v5 = vpop.f32.mrb[25].mxu0 }
 0x326   :  { %v1213_v6 = vpop.f32.mrb[26].mxu0 }
 0x327   :  { %v671_v7 = vpack.c.bf16 %v1213_v6, %v1212_v4  ;;  %v638_v8 = vpop.f32.mrb[27].mxu0  ;;  %1225 = vmatpush3.bf16.msra.mxu1 %v669_v1 }
 0x328   :  { %v670_v9 = vpack.c.bf16 %v638_v8, %v635_v5 }
 0x32a   :  { %1226 = vmatprep.subr.bf16.mxu1 %v670_v9 }
 0x32b   :  { %1227 = vmatpush3.bf16.msra.mxu1 %v670_v9 }
 0x32c   :  { %v1216_v10 = vpop.f32.mrb[28].mxu0  ;;  %1228 = vmatprep.subr.bf16.mxu1 %v671_v7 }
 0x32d   :  { %v651_v11 = vpop.f32.mrb[29].mxu0 }
 0x32e   :  { %v1217_v12 = vpop.f32.mrb[30].mxu0 }
 0x32f   :  { %v673_v13 = vpack.c.bf16 %v1217_v12, %v1216_v10  ;;  %v654_v14 = vpop.f32.mrb[31].mxu0  ;;  %1229 = vmatpush3.bf16.msra.mxu1 %v671_v7 }
 0x330   :  { %v672_v15 = vpack.c.bf16 %v654_v14, %v651_v11 }
 0x332   :  { %1230 = vmatprep.subr.bf16.mxu1 %v672_v15 }
 0x333   :  { %1231 = vmatpush3.bf16.msra.mxu1 %v672_v15 }
 0x334   :  { %1232 = vmatprep.subr.bf16.mxu1 %v673_v13 }
 0x337   :  { %1233 = vmatpush3.bf16.msra.mxu1 %v673_v13 }
 0x33a   :  { %1235 = vmatmul.mubr.bf16.vlgmr.msra.gmra.mrb[16].mxu1 %v1594_v47 }
 0x33b   :  { %1238 = vmatprep.mubr.bf16.mxu1 %v1596_v48 }
 0x342   :  { %1239 = vmatmul.mubr.bf16.gmra.mrb[20].mxu1 %v1600_v49 }
 0x343   :  { %1242 = vmatprep.mubr.bf16.mxu1 %v1602_v50 }
 0x34a   :  { %1243 = vmatmul.mubr.bf16.gmra.mrb[24].mxu1 %v1606_v51 }
 0x34b   :  { %1246 = vmatprep.mubr.bf16.mxu1 %v1608_v52 }
 0x352   :  { %1247 = vmatmul.mubr.bf16.gmra.mrb[28].mxu1 %v1612_v53 }
 0x40d   :  { %v1236_v47 = vpop.f32.mrb[16].mxu1 }
 0x40e   :  { %v724_v48 = vadd.f32 %v1236_v47, %v1057_v18  ;;  %v715_v49 = vpop.f32.mrb[17].mxu1 }
 0x40f   :  { %v716_v19 = vadd.f32 %v1057_v18, %v715_v49  ;;  %v1237_v50 = vpop.f32.mrb[18].mxu1 }
 0x410   :  { %v727_v20 = vadd.f32 %v1237_v50, %v1057_v18  ;;  %v718_v51 = vpop.f32.mrb[19].mxu1  ;;  %v783_v52 = vsel %vm780_vm0, %v724_v48, -1e+30 }
 0x411   :  { %v719_v53 = vadd.f32 %v1057_v18, %v718_v51  ;;  %801 = vmax.xlane.f32.xlu1 %v783_v52  ;;  %v781_v21 = vsel %vm780_vm0, %v716_v19, -1e+30 }
 0x412   :  { %797 = vmax.xlane.f32.xlu0 %v781_v21  ;;  %v784_v22 = vsel %vm780_vm0, %v727_v20, -1e+30 }
 0x413   :  { %v782_v24 = vsel %vm780_vm0, %v719_v53, -1e+30 }
 0x415   :  { %803 = vmax.xlane.f32.xlu1 %v784_v22  ;;  %v1240_v23 = vpop.f32.mrb[20].mxu1 }
 0x416   :  { %v740_v25 = vadd.f32 %v1240_v23, %v1057_v18  ;;  %v731_v26 = vpop.f32.mrb[21].mxu1  ;;  %799 = vmax.xlane.f32.xlu0 %v782_v24 }
 0x417   :  { %v1241_v27 = vpop.f32.mrb[22].mxu1  ;;  %v732_v31 = vadd.f32 %v1057_v18, %v731_v26 }
 0x418   :  { %v743_v28 = vadd.f32 %v1241_v27, %v1057_v18  ;;  %v734_v29 = vpop.f32.mrb[23].mxu1  ;;  %v787_v30 = vsel %vm780_vm0, %v740_v25, -1e+30 }
 0x419   :  { %v735_v32 = vadd.f32 %v1057_v18, %v734_v29  ;;  %v785_v35 = vsel %vm780_vm0, %v732_v31, -1e+30 }
 0x41a   :  { %809 = vmax.xlane.f32.xlu0 %v787_v30  ;;  %v788_v33 = vsel %vm780_vm0, %v743_v28, -1e+30 }
 0x41b   :  { %811 = vmax.xlane.f32.xlu1 %v788_v33  ;;  %v786_v38 = vsel %vm780_vm0, %v735_v32, -1e+30 }
 0x41d   :  { %v1244_v34 = vpop.f32.mrb[24].mxu1 }
 0x41e   :  { %v756_v36 = vadd.f32 %v1244_v34, %v1057_v18  ;;  %v747_v37 = vpop.f32.mrb[25].mxu1  ;;  %805 = vmax.xlane.f32.xlu0 %v785_v35 }
 0x41f   :  { %v1245_v39 = vpop.f32.mrb[26].mxu1  ;;  %807 = vmax.xlane.f32.xlu1 %v786_v38  ;;  %v748_v43 = vadd.f32 %v1057_v18, %v747_v37 }
 0x420   :  { %v759_v40 = vadd.f32 %v1245_v39, %v1057_v18  ;;  %v750_v41 = vpop.f32.mrb[27].mxu1  ;;  %v791_v42 = vsel %vm780_vm0, %v756_v36, -1e+30 }
 0x421   :  { %v751_v44 = vadd.f32 %v1057_v18, %v750_v41  ;;  %v1654_v54 = vsel %vm780_vm0, %v748_v43, -1e+30 }
 0x422   :  { %817 = vmax.xlane.f32.xlu0 %v791_v42  ;;  %v792_v45 = vsel %vm780_vm0, %v759_v40, -1e+30 }
 0x423   :  { %819 = vmax.xlane.f32.xlu1 %v792_v45  ;;  %v1659_v57 = vsel %vm780_vm0, %v751_v44, -1e+30 }
 0x425   :  { %v1248_v46 = vpop.f32.mrb[28].mxu1 }
 0x426   :  { %v763_v55 = vpop.f32.mrb[29].mxu1  ;;  %813 = vmax.xlane.f32.xlu0 %v1654_v54  ;;  %v772_v61 = vadd.f32 %v1248_v46, %v1057_v18 }
 0x427   :  { %v764_v58 = vadd.f32 %v1057_v18, %v763_v55  ;;  %v1249_v59 = vpop.f32.mrb[30].mxu1  ;;  %815 = vmax.xlane.f32.xlu1 %v1659_v57 }
 0x428   :  { %v766_v60 = vpop.f32.mrb[31].mxu1  ;;  %v775_v0 = vadd.f32 %v1249_v59, %v1057_v18  ;;  %v1674_v1 = vsel %vm780_vm0, %v772_v61, -1e+30 }
 0x429   :  { %v767_v62 = vadd.f32 %v1057_v18, %v766_v60  ;;  %v1664_v63 = vsel %vm780_vm0, %v764_v58, -1e+30 }
 0x42a   :  { %821 = vmax.xlane.f32.xlu0 %v1664_v63  ;;  %v1679_v2 = vsel %vm780_vm0, %v775_v0, -1e+30 }
 0x42b   :  { %v1669_v56 = vsel %vm780_vm0, %v767_v62, -1e+30 }
 0x42c   :  { %823 = vmax.xlane.f32.xlu1 %v1669_v56 }
 0x42e   :  { %825 = vmax.xlane.f32.xlu0 %v1674_v1 }
 0x430   :  { %827 = vmax.xlane.f32.xlu1 %v1679_v2 }
 0x49e   :  { %v802_v3 = vpop.xlane.xlu1 %801 }
 0x49f   :  { %v1682_v4 = vsub.f32 %v783_v52, %v802_v3  ;;  %v798_v5 = vpop.xlane.xlu0 %797 }
 0x4a0   :  { %v1684_v6 = vsub.f32 %v781_v21, %v798_v5 }
 0x4a1   :  { %v849_v7 = vmul.f32 1.442695, %v1682_v4 }
 0x4a2   :  { %v845_v8 = vmul.f32 1.442695, %v1684_v6  ;;  %v804_v9 = vpop.xlane.xlu1 %803 }
 0x4a3   :  { %1291 = vpow2.f32 %v849_v7  ;;  %v1688_v10 = vsub.f32 %v784_v22, %v804_v9  ;;  %v800_v11 = vpop.xlane.xlu0 %799 }
 0x4a4   :  { %v1690_v12 = vsub.f32 %v782_v24, %v800_v11  ;;  %1293 = vpow2.f32 %v845_v8 }
 0x4a5   :  { %v851_v13 = vmul.f32 1.442695, %v1688_v10 }
 0x4a6   :  { %v847_v14 = vmul.f32 1.442695, %v1690_v12 }
 0x4a7   :  { %1295 = vpow2.f32 %v851_v13  ;;  %v810_v15 = vpop.xlane.xlu0 %809 }
 0x4a8   :  { %v1694_v16 = vsub.f32 %v787_v30, %v810_v15  ;;  %v812_v18 = vpop.xlane.xlu1 %811  ;;  %1297 = vpow2.f32 %v847_v14 }
 0x4a9   :  { %v1696_v47 = vsub.f32 %v788_v33, %v812_v18 }
 0x4aa   :  { %v857_v48 = vmul.f32 1.442695, %v1694_v16 }
 0x4ab   :  { %v859_v49 = vmul.f32 1.442695, %v1696_v47  ;;  %v806_v19 = vpop.xlane.xlu0 %805 }
 0x4ac   :  { %1299 = vpow2.f32 %v857_v48  ;;  %v1700_v50 = vsub.f32 %v785_v35, %v806_v19  ;;  %v808_v20 = vpop.xlane.xlu1 %807 }
 0x4ad   :  { %v1292_v51 = vpop.eup %1291  ;;  %1301 = vpow2.f32 %v859_v49  ;;  %v1702_v52 = vsub.f32 %v786_v38, %v808_v20 }
 0x4ae   :  { %v853_v53 = vmul.f32 1.442695, %v1700_v50  ;;  %v879_v21 = vsel %vm780_vm0, %v1292_v51, 0.0  ;;  %v1294_v22 = vpop.eup %1293 }
 0x4af   :  { %v855_v23 = vmul.f32 1.442695, %v1702_v52  ;;  %897 = vadd.xlane.f32.xlu0 %v879_v21  ;;  %v818_v24 = vpop.xlane.xlu0 %817  ;;  %v877_v31 = vsel %vm780_vm0, %v1294_v22, 0.0 }
 0x4b0   :  { %1303 = vpow2.f32 %v853_v53  ;;  %v1708_v25 = vsub.f32 %v791_v42, %v818_v24  ;;  %v820_v26 = vpop.xlane.xlu1 %819 }
 0x4b1   :  { %v1296_v27 = vpop.eup %1295  ;;  %1305 = vpow2.f32 %v855_v23  ;;  %v1710_v28 = vsub.f32 %v792_v45, %v820_v26 }
 0x4b2   :  { %v865_v29 = vmul.f32 1.442695, %v1708_v25  ;;  %v880_v30 = vsel %vm780_vm0, %v1296_v27, 0.0  ;;  %v1298_v32 = vpop.eup %1297 }
 0x4b3   :  { %v867_v33 = vmul.f32 1.442695, %v1710_v28  ;;  %899 = vadd.xlane.f32.xlu1 %v880_v30  ;;  %893 = vadd.xlane.f32.xlu0 %v877_v31  ;;  %v814_v34 = vpop.xlane.xlu0 %813  ;;  %v878_v40 = vsel %vm780_vm0, %v1298_v32, 0.0 }
 0x4b4   :  { %1307 = vpow2.f32 %v865_v29  ;;  %v1719_v35 = vsub.f32 %v1654_v54, %v814_v34  ;;  %v816_v36 = vpop.xlane.xlu1 %815 }
 0x4b5   :  { %1309 = vpow2.f32 %v867_v33  ;;  %v1722_v37 = vsub.f32 %v1659_v57, %v816_v36 }
 0x4b6   :  { %v1300_v38 = vpop.eup %1299  ;;  %v861_v39 = vmul.f32 1.442695, %v1719_v35 }
 0x4b7   :  { %v1302_v41 = vpop.eup %1301  ;;  %v863_v42 = vmul.f32 1.442695, %v1722_v37  ;;  %895 = vadd.xlane.f32.xlu1 %v878_v40  ;;  %v822_v43 = vpop.xlane.xlu0 %821  ;;  %v883_v44 = vsel %vm780_vm0, %v1300_v38, 0.0 }
 0x4b8   :  { %1311 = vpow2.f32 %v861_v39  ;;  %v1731_v45 = vsub.f32 %v1664_v63, %v822_v43  ;;  %905 = vadd.xlane.f32.xlu0 %v883_v44  ;;  %v884_v58 = vsel %vm780_vm0, %v1302_v41, 0.0 }
 0x4b9   :  { %1313 = vpow2.f32 %v863_v42  ;;  %v824_v46 = vpop.xlane.xlu1 %823 }
 0x4ba   :  { %v1304_v54 = vpop.eup %1303  ;;  %v869_v55 = vmul.f32 1.442695, %v1731_v45  ;;  %v1735_v57 = vsub.f32 %v1669_v56, %v824_v46 }
 0x4bb   :  { %v1306_v59 = vpop.eup %1305  ;;  %907 = vadd.xlane.f32.xlu1 %v884_v58  ;;  %v826_v60 = vpop.xlane.xlu0 %825  ;;  %v881_v61 = vsel %vm780_vm0, %v1304_v54, 0.0 }
 0x4bc   :  { %1315 = vpow2.f32 %v869_v55  ;;  %v871_v62 = vmul.f32 1.442695, %v1735_v57  ;;  %v1743_v63 = vsub.f32 %v1674_v1, %v826_v60  ;;  %901 = vadd.xlane.f32.xlu0 %v881_v61  ;;  %v882_v7 = vsel %vm780_vm0, %v1306_v59, 0.0 }
 0x4bd   :  { %v828_v0 = vpop.xlane.xlu1 %827 }
 0x4be   :  { %v1308_v3 = vpop.eup %1307  ;;  %1317 = vpow2.f32 %v871_v62  ;;  %v873_v56 = vmul.f32 1.442695, %v1743_v63  ;;  %v1747_v5 = vsub.f32 %v1679_v2, %v828_v0 }
 0x4bf   :  { %v1310_v8 = vpop.eup %1309  ;;  %903 = vadd.xlane.f32.xlu1 %v882_v7  ;;  %v887_v9 = vsel %vm780_vm0, %v1308_v3, 0.0 }
 0x4c0   :  { %1319 = vpow2.f32 %v873_v56  ;;  %v875_v1 = vmul.f32 1.442695, %v1747_v5  ;;  %913 = vadd.xlane.f32.xlu0 %v887_v9  ;;  %v888_v13 = vsel %vm780_vm0, %v1310_v8, 0.0 }
 0x4c2   :  { %v1312_v11 = vpop.eup %1311  ;;  %1321 = vpow2.f32 %v875_v1 }
 0x4c3   :  { %v1314_v14 = vpop.eup %1313  ;;  %915 = vadd.xlane.f32.xlu1 %v888_v13  ;;  %v885_v2 = vsel %vm780_vm0, %v1312_v11, 0.0 }
 0x4c4   :  { %909 = vadd.xlane.f32.xlu0 %v885_v2  ;;  %v886_v18 = vsel %vm780_vm0, %v1314_v14, 0.0 }
 0x4c6   :  { %v1316_v15 = vpop.eup %1315 }
 0x4c7   :  { %911 = vadd.xlane.f32.xlu1 %v886_v18  ;;  %v889_v48 = vsel %vm780_vm0, %v1316_v15, 0.0 }
 0x4c8   :  { %v1318_v49 = vpop.eup %1317  ;;  %917 = vadd.xlane.f32.xlu0 %v889_v48 }
 0x4c9   :  { %v890_v19 = vsel %vm780_vm0, %v1318_v49, 0.0 }
 0x4ca   :  { %v1320_v20 = vpop.eup %1319 }
 0x4cb   :  { %919 = vadd.xlane.f32.xlu1 %v890_v19  ;;  %v891_v51 = vsel %vm780_vm0, %v1320_v20, 0.0 }
 0x4cc   :  { %v1322_v53 = vpop.eup %1321  ;;  %921 = vadd.xlane.f32.xlu0 %v891_v51 }
 0x4cd   :  { %v892_v21 = vsel %vm780_vm0, %v1322_v53, 0.0 }
 0x4cf   :  { %923 = vadd.xlane.f32.xlu1 %v892_v21 }
 0x53c   :  { %v898_v22 = vpop.xlane.xlu0 %897 }
 0x53d   :  { %1323 = vlog2.f32 %v898_v22 }
 0x540   :  { %v900_v23 = vpop.xlane.xlu1 %899  ;;  %v894_v24 = vpop.xlane.xlu0 %893 }
 0x541   :  { %1325 = vlog2.f32 %v900_v23 }
 0x542   :  { %1327 = vlog2.f32 %v894_v24 }
 0x544   :  { %v896_v26 = vpop.xlane.xlu1 %895 }
 0x545   :  { %1329 = vlog2.f32 %v896_v26  ;;  %v906_v27 = vpop.xlane.xlu0 %905 }
 0x546   :  { %1331 = vlog2.f32 %v906_v27 }
 0x547   :  { %v1324_v29 = vpop.eup %1323 }
 0x548   :  { %v930_v30 = vmul.f32 0.6931472, %v1324_v29  ;;  %v908_v31 = vpop.xlane.xlu1 %907 }
 0x549   :  { %1333 = vlog2.f32 %v908_v31  ;;  %v902_v32 = vpop.xlane.xlu0 %901 }
 0x54a   :  { %v959_v33 = vsub.f32 %v1682_v4, %v930_v30  ;;  %1335 = vlog2.f32 %v902_v32 }
 0x54b   :  { %v1326_v34 = vpop.eup %1325 }
 0x54c   :  { %v1328_v36 = vpop.eup %1327  ;;  %v975_v38 = vsel %vm780_vm0, %v959_v33, 0.0  ;;  %v932_v39 = vmul.f32 0.6931472, %v1326_v34  ;;  %v904_v40 = vpop.xlane.xlu1 %903 }
 0x54d   :  { %991 = vst [vmem:[#allocation10 + $0x10] sm:$0xff] %v975_v38  ;;  %v926_v41 = vmul.f32 0.6931472, %v1328_v36  ;;  %1337 = vlog2.f32 %v904_v40  ;;  %v914_v42 = vpop.xlane.xlu0 %913 }
 0x54e   :  { %v960_v43 = vsub.f32 %v1688_v10, %v932_v39  ;;  %1339 = vlog2.f32 %v914_v42 }
 0x54f   :  { %v1330_v44 = vpop.eup %1329  ;;  %v957_v46 = vsub.f32 %v1684_v6, %v926_v41 }
 0x550   :  { %v1332_v54 = vpop.eup %1331  ;;  %v976_v4 = vsel %vm780_vm0, %v960_v43, 0.0  ;;  %v928_v55 = vmul.f32 0.6931472, %v1330_v44  ;;  %v916_v58 = vpop.xlane.xlu1 %915 }
 0x551   :  { %992 = vst [vmem:[#allocation10 + $0x18] sm:$0xff] %v976_v4  ;;  %v973_v59 = vsel %vm780_vm0, %v957_v46, 0.0  ;;  %v938_v60 = vmul.f32 0.6931472, %v1332_v54  ;;  %1341 = vlog2.f32 %v916_v58  ;;  %v910_v61 = vpop.xlane.xlu0 %909 }
 0x552   :  { %989 = vst [vmem:[#allocation10] sm:$0xff] %v973_v59  ;;  %v958_v10 = vsub.f32 %v1690_v12, %v928_v55  ;;  %1343 = vlog2.f32 %v910_v61 }
 0x553   :  { %v1334_v62 = vpop.eup %1333  ;;  %v963_v6 = vsub.f32 %v1694_v16, %v938_v60 }
 0x554   :  { %v1336_v0 = vpop.eup %1335  ;;  %v974_v3 = vsel %vm780_vm0, %v958_v10, 0.0  ;;  %v940_v56 = vmul.f32 0.6931472, %v1334_v62  ;;  %v912_v7 = vpop.xlane.xlu1 %911 }
 0x555   :  { %990 = vst [vmem:[#allocation10 + $0x8] sm:$0xff] %v974_v3  ;;  %v979_v8 = vsel %vm780_vm0, %v963_v6, 0.0  ;;  %v934_v9 = vmul.f32 0.6931472, %v1336_v0  ;;  %1345 = vlog2.f32 %v912_v7  ;;  %v918_v1 = vpop.xlane.xlu0 %917 }
 0x556   :  { %995 = vst [vmem:[#allocation10 + $0x30] sm:$0xff] %v979_v8  ;;  %v964_v12 = vsub.f32 %v1696_v47, %v940_v56  ;;  %1347 = vlog2.f32 %v918_v1 }
 0x557   :  { %v1338_v11 = vpop.eup %1337  ;;  %v961_v16 = vsub.f32 %v1700_v50, %v934_v9 }
 0x558   :  { %v1340_v13 = vpop.eup %1339  ;;  %v980_v14 = vsel %vm780_vm0, %v964_v12, 0.0  ;;  %v936_v2 = vmul.f32 0.6931472, %v1338_v11  ;;  %v920_v15 = vpop.xlane.xlu1 %919 }
 0x559   :  { %996 = vst [vmem:[#allocation10 + $0x38] sm:$0xff] %v980_v14  ;;  %v977_v18 = vsel %vm780_vm0, %v961_v16, 0.0  ;;  %v946_v48 = vmul.f32 0.6931472, %v1340_v13  ;;  %1349 = vlog2.f32 %v920_v15  ;;  %v922_v49 = vpop.xlane.xlu0 %921 }
 0x55a   :  { %993 = vst [vmem:[#allocation10 + $0x20] sm:$0xff] %v977_v18  ;;  %v962_v47 = vsub.f32 %v1702_v52, %v936_v2  ;;  %1351 = vlog2.f32 %v922_v49 }
 0x55b   :  { %v1342_v19 = vpop.eup %1341  ;;  %v967_v50 = vsub.f32 %v1708_v25, %v946_v48 }
 0x55c   :  { %v1344_v20 = vpop.eup %1343  ;;  %v978_v51 = vsel %vm780_vm0, %v962_v47, 0.0  ;;  %v948_v53 = vmul.f32 0.6931472, %v1342_v19  ;;  %v924_v21 = vpop.xlane.xlu1 %923 }
 0x55d   :  { %994 = vst [vmem:[#allocation10 + $0x28] sm:$0xff] %v978_v51  ;;  %v983_v22 = vsel %vm780_vm0, %v967_v50, 0.0  ;;  %v942_v23 = vmul.f32 0.6931472, %v1344_v20  ;;  %1353 = vlog2.f32 %v924_v21 }
 0x55e   :  { %999 = vst [vmem:[#allocation10 + $0x50] sm:$0xff] %v983_v22  ;;  %v968_v24 = vsub.f32 %v1710_v28, %v948_v53 }
 0x55f   :  { %v1346_v52 = vpop.eup %1345  ;;  %v965_v26 = vsub.f32 %v1719_v35, %v942_v23 }
 0x560   :  { %v1348_v27 = vpop.eup %1347  ;;  %v984_v25 = vsel %vm780_vm0, %v968_v24, 0.0  ;;  %v944_v29 = vmul.f32 0.6931472, %v1346_v52 }
 0x561   :  { %1000 = vst [vmem:[#allocation10 + $0x58] sm:$0xff] %v984_v25  ;;  %v981_v30 = vsel %vm780_vm0, %v965_v26, 0.0  ;;  %v950_v31 = vmul.f32 0.6931472, %v1348_v27 }
 0x562   :  { %997 = vst [vmem:[#allocation10 + $0x40] sm:$0xff] %v981_v30  ;;  %v966_v32 = vsub.f32 %v1722_v37, %v944_v29 }
 0x563   :  { %v1350_v33 = vpop.eup %1349  ;;  %v969_v34 = vsub.f32 %v1731_v45, %v950_v31 }
 0x564   :  { %v1352_v28 = vpop.eup %1351  ;;  %v982_v35 = vsel %vm780_vm0, %v966_v32, 0.0  ;;  %v952_v36 = vmul.f32 0.6931472, %v1350_v33 }
 0x565   :  { %998 = vst [vmem:[#allocation10 + $0x48] sm:$0xff] %v982_v35  ;;  %v985_v38 = vsel %vm780_vm0, %v969_v34, 0.0  ;;  %v954_v39 = vmul.f32 0.6931472, %v1352_v28 }
 0x566   :  { %1001 = vst [vmem:[#allocation10 + $0x60] sm:$0xff] %v985_v38  ;;  %v970_v40 = vsub.f32 %v1735_v57, %v952_v36 }
 0x567   :  { %v1354_v41 = vpop.eup %1353  ;;  %v971_v42 = vsub.f32 %v1743_v63, %v954_v39 }
 0x568   :  { %v986_v37 = vsel %vm780_vm0, %v970_v40, 0.0  ;;  %v956_v45 = vmul.f32 0.6931472, %v1354_v41 }
 0x569   :  { %1002 = vst [vmem:[#allocation10 + $0x68] sm:$0xff] %v986_v37  ;;  %v987_v43 = vsel %vm780_vm0, %v971_v42, 0.0 }
 0x56a   :  { %1003 = vst [vmem:[#allocation10 + $0x70] sm:$0xff] %v987_v43  ;;  %v972_v44 = vsub.f32 %v1747_v5, %v956_v45 }
 0x56c   :  { %v988_v57 = vsel %vm780_vm0, %v972_v44, 0.0 }
 0x56d   :  { %1004 = vst [vmem:[#allocation10 + $0x78] sm:$0xff] %v988_v57 }
 0x56e   :  { %1454 = shalt.err (!%p1451_p8)
}
 0x56f   :  { %s1455_s26 = scalar_lea.hbm %s1834_s6, 2048 }
 0x570   :  { %p1456_p9 = scmp.ne.s32.totalorder %s1834_s6, %s1455_s26  ;;  %p1459_p10 = scmp.lt.u32.totalorder %s1455_s26, %s1834_s6 }
 0x572   :  { %p1461_p11 = pnand %p1459_p10, %p1456_p9 }
 0x574   :  { %1464 = shalt.err (!%p1461_p11)
}
 0x575   :  { %s1480_s7 = smov 128   ;;  %s1481_s8 = smov 8  }
 0x576   :  { %1016 = dma.vmem_to_hbm [thread:$0]  %s1011_s21, 2048, %s1834_s6, [#allocation4], %s1480_s7, %s1480_s7, %s1481_s8  }
 0x577   :  { %1471 = dma.done.wait [#allocation4], 2048  }
 0x578   :  { %1472 = vsyncadd [#allocation4], 4294965248 }
 0x579   :  { %1020 = vsyncpa [#allocation3], 1 }
 0x57a   :  { %1021 = vsyncpa [#allocation6], 1 }
 0x57b   :  { %1022 = vsyncpa [#allocation9], 1 }
 0x57c   :  { %1023 = vsyncpa [#allocation4], 1 }

</bundles_post_ra>
